<compile_context>
chip_gen: v7x
topology: tpu7x:2x2x1
jax: 0.10.0
libtpu: 0.0.40
codegen_flags: <defaults>
</compile_context>

<pallas_src>
import jax
import jax.numpy as jnp
from jax.experimental import pallas as pl
from jax.experimental.pallas import tpu as pltpu


# ----------------------------------------------------------------------------
# Pallas kernel
#   pre = Wg^T @ gate + Wx^T @ skip + (bg + bx)      (channels on sublanes)
#   a   = relu(pre)
#   psi = sigmoid(sum_k wp[k] * a[k, :] + bp)
#   out = skip * psi
# ----------------------------------------------------------------------------
def _vpu_contract(wt, x):
    """(K, C) x (C, TP) -> (K, TP) channel contraction.

    Unrolled into C broadcast multiply-adds on the VPU for modest channel
    counts (the MXU push/pop + relayout cost is never recovered for a K<=8-wide
    contraction, and the kernel is HBM-bound anyway).  MXU fallback only for
    very wide channel counts.
    """
    C = x.shape[0]
    if C <= 64:
        acc = wt[:, 0:1] * x[0:1, :]
        for c in range(1, C):
            acc = acc + wt[:, c:c + 1] * x[c:c + 1, :]
        return acc
    return jnp.dot(wt, x, preferred_element_type=jnp.float32)


def _attention_gate_kernel(gate_ref, skip_ref, wgt_ref, wxt_ref,
                           b_a_ref, wp_ref, bp_ref, out_ref):
    # Blocks are (BN, C, TILE_P): pixels on lanes (dense), channels on sublanes.
    bn = gate_ref.shape[0]
    for n in range(bn):                               # static unroll over in-block batch
        gate = gate_ref[n].astype(jnp.float32)        # (C_g, TP)
        skip = skip_ref[n].astype(jnp.float32)        # (C_l, TP)

        # 1x1 conv (+ folded BN) for both branches; f32 accumulation.
        pre = _vpu_contract(wgt_ref[...], gate) + _vpu_contract(wxt_ref[...], skip)
        a = jnp.maximum(pre + b_a_ref[...], 0.0)      # (K, TP)  ReLU

        # psi conv (K -> 1): dense sublane reduce over fully-packed vregs.
        psi_lin = jnp.sum(wp_ref[...] * a, axis=0, keepdims=True) + bp_ref[...]  # (1, TP)

        # Sigmoid via a single tanh transcendental on the EUP (no VALU divide).
        psi = 0.5 * (jnp.tanh(0.5 * psi_lin) + 1.0)   # (1, TP)

        # Sublane-broadcast multiply; lane-dense store.  For a partial last
        # pixel block Pallas clamps the copy-back to the valid region.
        out_ref[n] = (skip * psi).astype(out_ref.dtype)


# ----------------------------------------------------------------------------
# Block / tile selection (bandwidth- and VMEM-aware) + pallas_call wrapper
# ----------------------------------------------------------------------------
def _round_up(x, m):
    return (x + m - 1) // m * m


_HARD_PX_CAP = 128 * 1024              # per perf review: 32K-128K pixel tiles
_TILE_VMEM_BUDGET = 28 * 1024 * 1024   # pipeline buffers + f32 temps per step
_TARGET_STEP_BYTES = 4 * 1024 * 1024   # ~4 MB/step amortizes 0.35us even @3.2TB/s
_MIN_STEPS = 4                         # keep v7x's two TensorCores fed if possible


def _choose_blocking(N, C_g, C_l, P, K, gate_isz, skip_isz):
    """Pick (batch_per_block, pixel_tile, vmem_limit_bytes)."""
    # HBM bytes per pixel per batch element (gate read + skip read + out write).
    hbm_px = C_g * gate_isz + 2 * C_l * skip_isz
    # VMEM bytes per pixel per batch element: double-buffered pipeline tiles +
    # f32 in-kernel temps (gate/skip upcasts, pre, a, psi, out cast).
    tmp_px = (C_g + C_l + 2 * K + 4) * 4
    vmem_px = 2 * hbm_px + tmp_px

    # Batch blocking: for small images put the whole batch in each block so a
    # grid step still moves a useful number of bytes.
    p_lanes = _round_up(P, 128)
    bn = 1
    if 1 < N <= 8 and p_lanes * hbm_px < _TARGET_STEP_BYTES \
            and N * p_lanes * vmem_px <= _TILE_VMEM_BUDGET:
        bn = N

    # Pixel tile: as large as the VMEM budget allows (the op is HBM-bound, so
    # big tiles amortize the fixed per-step overhead), hard-capped so the same
    # sizing stays safe under v7x's 64 MiB physical VMEM.
    cap = _TILE_VMEM_BUDGET // max(bn * vmem_px, 1)
    tile_p = max(128, int(min(_HARD_PX_CAP, cap)) // 128 * 128)

    # Keep >= _MIN_STEPS grid steps when the image is big enough to split
    # ('parallel' grid axes are sharded across v7x's two TensorCores).
    batch_blocks = N // bn
    if P > 4 * 128:
        px_blocks = -(-P // min(tile_p, P))
        if batch_blocks * px_blocks < _MIN_STEPS:
            want_px_blocks = -(-_MIN_STEPS // batch_blocks)
            tile_p = min(tile_p, max(128, _round_up(-(-P // want_px_blocks), 128)))
    if tile_p >= P:
        tile_p = P                       # full-extent pixel block (always legal)

    # Scoped-VMEM limit from actual need plus headroom, < 64 MiB (v7x physical).
    need = bn * tile_p * (2 * hbm_px + tmp_px)
    vmem_limit = int(min(max(2 * need, 16 << 20), 48 << 20))
    return bn, tile_p, vmem_limit


def attention_block_pallas(gate3, skip3, wgt, wxt, b_a, wp, bp, *,
                           bn, tile_p, vmem_limit):
    """gate3: (N, C_g, P), skip3: (N, C_l, P)."""
    N, C_g, P = gate3.shape
    _, C_l, _ = skip3.shape
    K = wgt.shape[0]
    grid = (N // bn, pl.cdiv(P, tile_p))

    # Tiny, grid-invariant parameter blocks (stay VMEM-resident; negligible next
    # to the MB-scale activation tiles).
    full = lambda n, j: (0, 0)

    return pl.pallas_call(
        _attention_gate_kernel,
        out_shape=jax.ShapeDtypeStruct((N, C_l, P), skip3.dtype),
        grid_spec=pltpu.PrefetchScalarGridSpec(
            num_scalar_prefetch=0,
            grid=grid,
            in_specs=[
                pl.BlockSpec((bn, C_g, tile_p), lambda n, j: (n, 0, j)),  # gate
                pl.BlockSpec((bn, C_l, tile_p), lambda n, j: (n, 0, j)),  # skip
                pl.BlockSpec((K, C_g), full),   # W_gate^T  (BN folded)
                pl.BlockSpec((K, C_l), full),   # W_x^T     (BN folded)
                pl.BlockSpec((K, 1),   full),   # b_gate + b_x (folded & summed)
                pl.BlockSpec((K, 1),   full),   # w_psi (folded)
                pl.BlockSpec((1, 1),   full),   # b_psi (folded)
            ],
            out_specs=pl.BlockSpec((bn, C_l, tile_p), lambda n, j: (n, 0, j)),
        ),
        compiler_params=pltpu.CompilerParams(
            dimension_semantics=("parallel", "parallel"),
            vmem_limit_bytes=vmem_limit),
    )(gate3, skip3, wgt, wxt, b_a, wp, bp)


def attention_block(gate_nchw, skip_nchw, params):
    """Matches the PyTorch NCHW interface.  No transposes / pads / slices:
    NCHW -> (N, C, H*W) is a free reshape and ragged P is handled by partial
    last blocks inside the kernel, so the kernel is the only pass over HBM.
    Works for f32 or bf16 gate/skip (f32 accumulation inside the kernel)."""
    N, C_g, H, W = gate_nchw.shape
    _, C_l, _, _ = skip_nchw.shape
    P = H * W
    K = params["wgt"].shape[0]

    gate3 = gate_nchw.reshape(N, C_g, P)
    skip3 = skip_nchw.reshape(N, C_l, P)

    bn, tile_p, vmem_limit = _choose_blocking(
        N, C_g, C_l, P, K,
        jnp.dtype(gate_nchw.dtype).itemsize, jnp.dtype(skip_nchw.dtype).itemsize)

    out3 = attention_block_pallas(
        gate3, skip3,
        params["wgt"], params["wxt"], params["b_a"], params["wp"], params["bp"],
        bn=bn, tile_p=tile_p, vmem_limit=vmem_limit)

    return out3.reshape(N, C_l, H, W)


# ----------------------------------------------------------------------------
# Parameter setup: deterministic init + BatchNorm (eval-mode) folding
# ----------------------------------------------------------------------------
def _fold_bn(conv_w, conv_b, gamma, beta, mean, var, eps=1e-5):
    """Fold eval-mode BatchNorm into a 1x1 conv (matmul layout (C_in, C_out))."""
    scale = gamma / jnp.sqrt(var + eps)               # (C_out,)
    w = conv_w * scale[None, :]
    b = (conv_b - mean) * scale + beta
    return w, b


def make_params(key, F_g, F_l, n_coef):
    ks = jax.random.split(key, 9)
    f32 = jnp.float32
    wg_conv = jax.random.normal(ks[0], (F_g, n_coef), f32) * 0.1
    bg_conv = jax.random.normal(ks[1], (n_coef,), f32) * 0.1
    wx_conv = jax.random.normal(ks[2], (F_l, n_coef), f32) * 0.1
    bx_conv = jax.random.normal(ks[3], (n_coef,), f32) * 0.1
    wp_conv = jax.random.normal(ks[4], (n_coef, 1), f32) * 0.1
    bp_conv = jax.random.normal(ks[5], (1,), f32) * 0.1

    bn = lambda k, n: (
        1.0 + 0.1 * jax.random.normal(jax.random.fold_in(k, 0), (n,), f32),   # gamma
        0.1 * jax.random.normal(jax.random.fold_in(k, 1), (n,), f32),         # beta
        0.05 * jax.random.normal(jax.random.fold_in(k, 2), (n,), f32),        # running_mean
        1.0 + 0.1 * jax.random.uniform(jax.random.fold_in(k, 3), (n,), f32),  # running_var
    )
    g_g, b_g, m_g, v_g = bn(ks[6], n_coef)
    g_x, b_x, m_x, v_x = bn(ks[7], n_coef)
    g_p, b_p, m_p, v_p = bn(ks[8], 1)

    wg, bg = _fold_bn(wg_conv, bg_conv, g_g, b_g, m_g, v_g)
    wx, bx = _fold_bn(wx_conv, bx_conv, g_x, b_x, m_x, v_x)
    wp, bp = _fold_bn(wp_conv, bp_conv, g_p, b_p, m_p, v_p)

    return dict(
        wgt=jnp.transpose(wg),                      # (n_coef, F_g)
        wxt=jnp.transpose(wx),                      # (n_coef, F_l)
        b_a=(bg + bx).reshape(n_coef, 1),           # fused branch biases
        wp=wp.reshape(n_coef, 1),
        bp=bp.reshape(1, 1),
    )


# ----------------------------------------------------------------------------
# Pure-JAX reference (same folded-BN math) for correctness checking
# ----------------------------------------------------------------------------
def attention_block_ref(gate_nchw, skip_nchw, params):
    g = gate_nchw.astype(jnp.float32)
    s = skip_nchw.astype(jnp.float32)
    g1 = jnp.einsum("kc,nchw->nkhw", params["wgt"], g)
    x1 = jnp.einsum("kc,nchw->nkhw", params["wxt"], s)
    a = jnp.maximum(g1 + x1 + params["b_a"].reshape(1, -1, 1, 1), 0.0)
    psi_lin = jnp.einsum("nkhw,k->nhw", a, params["wp"].reshape(-1)) \
        + params["bp"].reshape(())
    psi = jax.nn.sigmoid(psi_lin)[:, None, :, :]
    return s * psi


if __name__ == "__main__":
    key = jax.random.PRNGKey(0)
    k_gate, k_skip, k_params, k_gate2, k_skip2 = jax.random.split(key, 5)

    # ---- Test 1: batch=2, F_g=F_l=4, 16x16 spatial, n_coefficients=8 --------
    N, F_g, F_l, n_coef, H, W = 2, 4, 4, 8, 16, 16
    gate = jax.random.normal(k_gate, (N, F_g, H, W), jnp.float32)
    skip = jax.random.normal(k_skip, (N, F_l, H, W), jnp.float32)
    params = make_params(k_params, F_g, F_l, n_coef)

    out = jax.block_until_ready(attention_block(gate, skip, params))
    ref = attention_block_ref(gate, skip, params)
    assert out.shape == (N, F_l, H, W)
    assert jnp.allclose(out, ref, atol=1e-5, rtol=1e-5), "f32 mismatch vs reference"

    # bf16 I/O path (halves HBM bytes; f32 accumulation inside the kernel)
    out_bf16 = jax.block_until_ready(
        attention_block(gate.astype(jnp.bfloat16), skip.astype(jnp.bfloat16), params))
    assert out_bf16.dtype == jnp.bfloat16
    assert jnp.allclose(out_bf16.astype(jnp.float32), ref, atol=5e-2, rtol=5e-2), \
        "bf16 mismatch vs reference"

    # ---- Test 2: ragged spatial size (P % tile_p != 0) exercising the -------
    # ---- partial-last-block path (no host-side pad/slice HBM round trips) ---
    N2, F_g2, F_l2, n_coef2, H2, W2 = 1, 6, 4, 8, 48, 48
    gate2 = jax.random.normal(k_gate2, (N2, F_g2, H2, W2), jnp.float32)
    skip2 = jax.random.normal(k_skip2, (N2, F_l2, H2, W2), jnp.float32)
    params2 = make_params(jax.random.fold_in(k_params, 1), F_g2, F_l2, n_coef2)
    out2 = jax.block_until_ready(attention_block(gate2, skip2, params2))
    ref2 = attention_block_ref(gate2, skip2, params2)
    assert out2.shape == (N2, F_l2, H2, W2)
    assert jnp.allclose(out2, ref2, atol=1e-5, rtol=1e-5), "ragged-P mismatch vs reference"

    print("KERNEL_OK")
</pallas_src>

<mosaic_0001>
module attributes {stable_mosaic.version = 11 : i64} {
  func.func @_attention_gate_kernel(%arg0: i32, %arg1: i32, %arg2: memref<2x4x256xf32, #tpu.memory_space<vmem>>, %arg3: memref<2x4x256xf32, #tpu.memory_space<vmem>>, %arg4: memref<8x4xf32, #tpu.memory_space<vmem>>, %arg5: memref<8x4xf32, #tpu.memory_space<vmem>>, %arg6: memref<8x1xf32, #tpu.memory_space<vmem>>, %arg7: memref<8x1xf32, #tpu.memory_space<vmem>>, %arg8: memref<1x1xf32, #tpu.memory_space<vmem>>, %arg9: memref<2x4x256xf32, #tpu.memory_space<vmem>>) attributes {dimension_semantics = [#tpu.dimension_semantics<parallel>, #tpu.dimension_semantics<parallel>], iteration_bounds = array<i64: 1, 1>, scalar_prefetch = 0 : i64, scratch_operands = 0 : i64, tpu.core_type = #tpu.core_type<tc>, window_params = [{transform_indices = @transform_0, window_bounds = array<i64: 2, 4, 256>}, {transform_indices = @transform_1, window_bounds = array<i64: 2, 4, 256>}, {pipeline_mode = #tpu.pipeline_mode<synchronous>, transform_indices = @transform_2, window_bounds = array<i64: 8, 4>}, {pipeline_mode = #tpu.pipeline_mode<synchronous>, transform_indices = @transform_3, window_bounds = array<i64: 8, 4>}, {pipeline_mode = #tpu.pipeline_mode<synchronous>, transform_indices = @transform_4, window_bounds = array<i64: 8, 1>}, {pipeline_mode = #tpu.pipeline_mode<synchronous>, transform_indices = @transform_5, window_bounds = array<i64: 8, 1>}, {pipeline_mode = #tpu.pipeline_mode<synchronous>, transform_indices = @transform_6, window_bounds = array<i64: 1, 1>}, {transform_indices = @transform_7, window_bounds = array<i64: 2, 4, 256>}]} {
    %c0 = arith.constant 0 : index
    %c0_0 = arith.constant 0 : index
    %c0_1 = arith.constant 0 : index
    %0 = vector.load %arg2[%c0, %c0_0, %c0_1] : memref<2x4x256xf32, #tpu.memory_space<vmem>>, vector<1x4x256xf32>
    %1 = vector.shape_cast %0 : vector<1x4x256xf32> to vector<4x256xf32>
    %c0_2 = arith.constant 0 : index
    %c0_3 = arith.constant 0 : index
    %c0_4 = arith.constant 0 : index
    %2 = vector.load %arg3[%c0_2, %c0_3, %c0_4] : memref<2x4x256xf32, #tpu.memory_space<vmem>>, vector<1x4x256xf32>
    %3 = vector.shape_cast %2 : vector<1x4x256xf32> to vector<4x256xf32>
    %c0_5 = arith.constant 0 : index
    %c0_6 = arith.constant 0 : index
    %4 = vector.load %arg4[%c0_5, %c0_6] : memref<8x4xf32, #tpu.memory_space<vmem>>, vector<8x4xf32>
    %5 = vector.extract_strided_slice %4 {offsets = [0, 0], sizes = [8, 1], strides = [1, 1]} : vector<8x4xf32> to vector<8x1xf32>
    %6 = vector.extract_strided_slice %1 {offsets = [0, 0], sizes = [1, 256], strides = [1, 1]} : vector<4x256xf32> to vector<1x256xf32>
    %7 = vector.broadcast %5 : vector<8x1xf32> to vector<8x256xf32>
    %8 = vector.broadcast %6 : vector<1x256xf32> to vector<8x256xf32>
    %9 = arith.mulf %7, %8 : vector<8x256xf32>
    %10 = vector.extract_strided_slice %4 {offsets = [0, 1], sizes = [8, 1], strides = [1, 1]} : vector<8x4xf32> to vector<8x1xf32>
    %11 = vector.extract_strided_slice %1 {offsets = [1, 0], sizes = [1, 256], strides = [1, 1]} : vector<4x256xf32> to vector<1x256xf32>
    %12 = vector.broadcast %10 : vector<8x1xf32> to vector<8x256xf32>
    %13 = vector.broadcast %11 : vector<1x256xf32> to vector<8x256xf32>
    %14 = arith.mulf %12, %13 : vector<8x256xf32>
    %15 = arith.addf %9, %14 : vector<8x256xf32>
    %16 = vector.extract_strided_slice %4 {offsets = [0, 2], sizes = [8, 1], strides = [1, 1]} : vector<8x4xf32> to vector<8x1xf32>
    %17 = vector.extract_strided_slice %1 {offsets = [2, 0], sizes = [1, 256], strides = [1, 1]} : vector<4x256xf32> to vector<1x256xf32>
    %18 = vector.broadcast %16 : vector<8x1xf32> to vector<8x256xf32>
    %19 = vector.broadcast %17 : vector<1x256xf32> to vector<8x256xf32>
    %20 = arith.mulf %18, %19 : vector<8x256xf32>
    %21 = arith.addf %15, %20 : vector<8x256xf32>
    %22 = vector.extract_strided_slice %4 {offsets = [0, 3], sizes = [8, 1], strides = [1, 1]} : vector<8x4xf32> to vector<8x1xf32>
    %23 = vector.extract_strided_slice %1 {offsets = [3, 0], sizes = [1, 256], strides = [1, 1]} : vector<4x256xf32> to vector<1x256xf32>
    %24 = vector.broadcast %22 : vector<8x1xf32> to vector<8x256xf32>
    %25 = vector.broadcast %23 : vector<1x256xf32> to vector<8x256xf32>
    %26 = arith.mulf %24, %25 : vector<8x256xf32>
    %27 = arith.addf %21, %26 : vector<8x256xf32>
    %c0_7 = arith.constant 0 : index
    %c0_8 = arith.constant 0 : index
    %28 = vector.load %arg5[%c0_7, %c0_8] : memref<8x4xf32, #tpu.memory_space<vmem>>, vector<8x4xf32>
    %29 = vector.extract_strided_slice %28 {offsets = [0, 0], sizes = [8, 1], strides = [1, 1]} : vector<8x4xf32> to vector<8x1xf32>
    %30 = vector.extract_strided_slice %3 {offsets = [0, 0], sizes = [1, 256], strides = [1, 1]} : vector<4x256xf32> to vector<1x256xf32>
    %31 = vector.broadcast %29 : vector<8x1xf32> to vector<8x256xf32>
    %32 = vector.broadcast %30 : vector<1x256xf32> to vector<8x256xf32>
    %33 = arith.mulf %31, %32 : vector<8x256xf32>
    %34 = vector.extract_strided_slice %28 {offsets = [0, 1], sizes = [8, 1], strides = [1, 1]} : vector<8x4xf32> to vector<8x1xf32>
    %35 = vector.extract_strided_slice %3 {offsets = [1, 0], sizes = [1, 256], strides = [1, 1]} : vector<4x256xf32> to vector<1x256xf32>
    %36 = vector.broadcast %34 : vector<8x1xf32> to vector<8x256xf32>
    %37 = vector.broadcast %35 : vector<1x256xf32> to vector<8x256xf32>
    %38 = arith.mulf %36, %37 : vector<8x256xf32>
    %39 = arith.addf %33, %38 : vector<8x256xf32>
    %40 = vector.extract_strided_slice %28 {offsets = [0, 2], sizes = [8, 1], strides = [1, 1]} : vector<8x4xf32> to vector<8x1xf32>
    %41 = vector.extract_strided_slice %3 {offsets = [2, 0], sizes = [1, 256], strides = [1, 1]} : vector<4x256xf32> to vector<1x256xf32>
    %42 = vector.broadcast %40 : vector<8x1xf32> to vector<8x256xf32>
    %43 = vector.broadcast %41 : vector<1x256xf32> to vector<8x256xf32>
    %44 = arith.mulf %42, %43 : vector<8x256xf32>
    %45 = arith.addf %39, %44 : vector<8x256xf32>
    %46 = vector.extract_strided_slice %28 {offsets = [0, 3], sizes = [8, 1], strides = [1, 1]} : vector<8x4xf32> to vector<8x1xf32>
    %47 = vector.extract_strided_slice %3 {offsets = [3, 0], sizes = [1, 256], strides = [1, 1]} : vector<4x256xf32> to vector<1x256xf32>
    %48 = vector.broadcast %46 : vector<8x1xf32> to vector<8x256xf32>
    %49 = vector.broadcast %47 : vector<1x256xf32> to vector<8x256xf32>
    %50 = arith.mulf %48, %49 : vector<8x256xf32>
    %51 = arith.addf %45, %50 : vector<8x256xf32>
    %52 = arith.addf %27, %51 : vector<8x256xf32>
    %c0_9 = arith.constant 0 : index
    %c0_10 = arith.constant 0 : index
    %53 = vector.load %arg6[%c0_9, %c0_10] : memref<8x1xf32, #tpu.memory_space<vmem>>, vector<8x1xf32>
    %54 = vector.broadcast %53 : vector<8x1xf32> to vector<8x256xf32>
    %55 = arith.addf %52, %54 : vector<8x256xf32>
    %cst = arith.constant 0.000000e+00 : f32
    %56 = vector.broadcast %cst : f32 to vector<8x256xf32>
    %57 = arith.maximumf %55, %56 : vector<8x256xf32>
    %c0_11 = arith.constant 0 : index
    %c0_12 = arith.constant 0 : index
    %58 = vector.load %arg7[%c0_11, %c0_12] : memref<8x1xf32, #tpu.memory_space<vmem>>, vector<8x1xf32>
    %59 = vector.broadcast %58 : vector<8x1xf32> to vector<8x256xf32>
    %60 = arith.mulf %59, %57 : vector<8x256xf32>
    %cst_13 = arith.constant dense<0.000000e+00> : vector<256xf32>
    %61 = vector.multi_reduction <add>, %60, %cst_13 [0] : vector<8x256xf32> to vector<256xf32>
    %62 = vector.shape_cast %61 : vector<256xf32> to vector<1x256xf32>
    %c0_14 = arith.constant 0 : index
    %c0_15 = arith.constant 0 : index
    %63 = vector.load %arg8[%c0_14, %c0_15] : memref<1x1xf32, #tpu.memory_space<vmem>>, vector<1x1xf32>
    %64 = vector.broadcast %63 : vector<1x1xf32> to vector<1x256xf32>
    %65 = arith.addf %62, %64 : vector<1x256xf32>
    %cst_16 = arith.constant 5.000000e-01 : f32
    %66 = vector.broadcast %cst_16 : f32 to vector<1x256xf32>
    %67 = arith.mulf %66, %65 : vector<1x256xf32>
    %68 = math.tanh %67 : vector<1x256xf32>
    %cst_17 = arith.constant 1.000000e+00 : f32
    %69 = vector.broadcast %cst_17 : f32 to vector<1x256xf32>
    %70 = arith.addf %68, %69 : vector<1x256xf32>
    %cst_18 = arith.constant 5.000000e-01 : f32
    %71 = vector.broadcast %cst_18 : f32 to vector<1x256xf32>
    %72 = arith.mulf %71, %70 : vector<1x256xf32>
    %73 = vector.broadcast %72 : vector<1x256xf32> to vector<4x256xf32>
    %74 = arith.mulf %3, %73 : vector<4x256xf32>
    %c0_19 = arith.constant 0 : index
    %c0_20 = arith.constant 0 : index
    %c0_21 = arith.constant 0 : index
    %75 = vector.load %arg9[%c0_19, %c0_20, %c0_21] : memref<2x4x256xf32, #tpu.memory_space<vmem>>, vector<1x4x256xf32>
    %76 = vector.shape_cast %75 : vector<1x4x256xf32> to vector<4x256xf32>
    %77 = vector.shape_cast %74 : vector<4x256xf32> to vector<1x4x256xf32>
    tpu.vector_store %arg9[%c0_19, %c0_20, %c0_21], %77 {strides = array<i32>} : memref<2x4x256xf32, #tpu.memory_space<vmem>>, vector<1x4x256xf32>,
    %c1 = arith.constant 1 : index
    %c0_22 = arith.constant 0 : index
    %c0_23 = arith.constant 0 : index
    %78 = vector.load %arg2[%c1, %c0_22, %c0_23] : memref<2x4x256xf32, #tpu.memory_space<vmem>>, vector<1x4x256xf32>
    %79 = vector.shape_cast %78 : vector<1x4x256xf32> to vector<4x256xf32>
    %c1_24 = arith.constant 1 : index
    %c0_25 = arith.constant 0 : index
    %c0_26 = arith.constant 0 : index
    %80 = vector.load %arg3[%c1_24, %c0_25, %c0_26] : memref<2x4x256xf32, #tpu.memory_space<vmem>>, vector<1x4x256xf32>
    %81 = vector.shape_cast %80 : vector<1x4x256xf32> to vector<4x256xf32>
    %c0_27 = arith.constant 0 : index
    %c0_28 = arith.constant 0 : index
    %82 = vector.load %arg4[%c0_27, %c0_28] : memref<8x4xf32, #tpu.memory_space<vmem>>, vector<8x4xf32>
    %83 = vector.extract_strided_slice %82 {offsets = [0, 0], sizes = [8, 1], strides = [1, 1]} : vector<8x4xf32> to vector<8x1xf32>
    %84 = vector.extract_strided_slice %79 {offsets = [0, 0], sizes = [1, 256], strides = [1, 1]} : vector<4x256xf32> to vector<1x256xf32>
    %85 = vector.broadcast %83 : vector<8x1xf32> to vector<8x256xf32>
    %86 = vector.broadcast %84 : vector<1x256xf32> to vector<8x256xf32>
    %87 = arith.mulf %85, %86 : vector<8x256xf32>
    %88 = vector.extract_strided_slice %82 {offsets = [0, 1], sizes = [8, 1], strides = [1, 1]} : vector<8x4xf32> to vector<8x1xf32>
    %89 = vector.extract_strided_slice %79 {offsets = [1, 0], sizes = [1, 256], strides = [1, 1]} : vector<4x256xf32> to vector<1x256xf32>
    %90 = vector.broadcast %88 : vector<8x1xf32> to vector<8x256xf32>
    %91 = vector.broadcast %89 : vector<1x256xf32> to vector<8x256xf32>
    %92 = arith.mulf %90, %91 : vector<8x256xf32>
    %93 = arith.addf %87, %92 : vector<8x256xf32>
    %94 = vector.extract_strided_slice %82 {offsets = [0, 2], sizes = [8, 1], strides = [1, 1]} : vector<8x4xf32> to vector<8x1xf32>
    %95 = vector.extract_strided_slice %79 {offsets = [2, 0], sizes = [1, 256], strides = [1, 1]} : vector<4x256xf32> to vector<1x256xf32>
    %96 = vector.broadcast %94 : vector<8x1xf32> to vector<8x256xf32>
    %97 = vector.broadcast %95 : vector<1x256xf32> to vector<8x256xf32>
    %98 = arith.mulf %96, %97 : vector<8x256xf32>
    %99 = arith.addf %93, %98 : vector<8x256xf32>
    %100 = vector.extract_strided_slice %82 {offsets = [0, 3], sizes = [8, 1], strides = [1, 1]} : vector<8x4xf32> to vector<8x1xf32>
    %101 = vector.extract_strided_slice %79 {offsets = [3, 0], sizes = [1, 256], strides = [1, 1]} : vector<4x256xf32> to vector<1x256xf32>
    %102 = vector.broadcast %100 : vector<8x1xf32> to vector<8x256xf32>
    %103 = vector.broadcast %101 : vector<1x256xf32> to vector<8x256xf32>
    %104 = arith.mulf %102, %103 : vector<8x256xf32>
    %105 = arith.addf %99, %104 : vector<8x256xf32>
    %c0_29 = arith.constant 0 : index
    %c0_30 = arith.constant 0 : index
    %106 = vector.load %arg5[%c0_29, %c0_30] : memref<8x4xf32, #tpu.memory_space<vmem>>, vector<8x4xf32>
    %107 = vector.extract_strided_slice %106 {offsets = [0, 0], sizes = [8, 1], strides = [1, 1]} : vector<8x4xf32> to vector<8x1xf32>
    %108 = vector.extract_strided_slice %81 {offsets = [0, 0], sizes = [1, 256], strides = [1, 1]} : vector<4x256xf32> to vector<1x256xf32>
    %109 = vector.broadcast %107 : vector<8x1xf32> to vector<8x256xf32>
    %110 = vector.broadcast %108 : vector<1x256xf32> to vector<8x256xf32>
    %111 = arith.mulf %109, %110 : vector<8x256xf32>
    %112 = vector.extract_strided_slice %106 {offsets = [0, 1], sizes = [8, 1], strides = [1, 1]} : vector<8x4xf32> to vector<8x1xf32>
    %113 = vector.extract_strided_slice %81 {offsets = [1, 0], sizes = [1, 256], strides = [1, 1]} : vector<4x256xf32> to vector<1x256xf32>
    %114 = vector.broadcast %112 : vector<8x1xf32> to vector<8x256xf32>
    %115 = vector.broadcast %113 : vector<1x256xf32> to vector<8x256xf32>
    %116 = arith.mulf %114, %115 : vector<8x256xf32>
    %117 = arith.addf %111, %116 : vector<8x256xf32>
    %118 = vector.extract_strided_slice %106 {offsets = [0, 2], sizes = [8, 1], strides = [1, 1]} : vector<8x4xf32> to vector<8x1xf32>
    %119 = vector.extract_strided_slice %81 {offsets = [2, 0], sizes = [1, 256], strides = [1, 1]} : vector<4x256xf32> to vector<1x256xf32>
    %120 = vector.broadcast %118 : vector<8x1xf32> to vector<8x256xf32>
    %121 = vector.broadcast %119 : vector<1x256xf32> to vector<8x256xf32>
    %122 = arith.mulf %120, %121 : vector<8x256xf32>
    %123 = arith.addf %117, %122 : vector<8x256xf32>
    %124 = vector.extract_strided_slice %106 {offsets = [0, 3], sizes = [8, 1], strides = [1, 1]} : vector<8x4xf32> to vector<8x1xf32>
    %125 = vector.extract_strided_slice %81 {offsets = [3, 0], sizes = [1, 256], strides = [1, 1]} : vector<4x256xf32> to vector<1x256xf32>
    %126 = vector.broadcast %124 : vector<8x1xf32> to vector<8x256xf32>
    %127 = vector.broadcast %125 : vector<1x256xf32> to vector<8x256xf32>
    %128 = arith.mulf %126, %127 : vector<8x256xf32>
    %129 = arith.addf %123, %128 : vector<8x256xf32>
    %130 = arith.addf %105, %129 : vector<8x256xf32>
    %c0_31 = arith.constant 0 : index
    %c0_32 = arith.constant 0 : index
    %131 = vector.load %arg6[%c0_31, %c0_32] : memref<8x1xf32, #tpu.memory_space<vmem>>, vector<8x1xf32>
    %132 = vector.broadcast %131 : vector<8x1xf32> to vector<8x256xf32>
    %133 = arith.addf %130, %132 : vector<8x256xf32>
    %cst_33 = arith.constant 0.000000e+00 : f32
    %134 = vector.broadcast %cst_33 : f32 to vector<8x256xf32>
    %135 = arith.maximumf %133, %134 : vector<8x256xf32>
    %c0_34 = arith.constant 0 : index
    %c0_35 = arith.constant 0 : index
    %136 = vector.load %arg7[%c0_34, %c0_35] : memref<8x1xf32, #tpu.memory_space<vmem>>, vector<8x1xf32>
    %137 = vector.broadcast %136 : vector<8x1xf32> to vector<8x256xf32>
    %138 = arith.mulf %137, %135 : vector<8x256xf32>
    %cst_36 = arith.constant dense<0.000000e+00> : vector<256xf32>
    %139 = vector.multi_reduction <add>, %138, %cst_36 [0] : vector<8x256xf32> to vector<256xf32>
    %140 = vector.shape_cast %139 : vector<256xf32> to vector<1x256xf32>
    %c0_37 = arith.constant 0 : index
    %c0_38 = arith.constant 0 : index
    %141 = vector.load %arg8[%c0_37, %c0_38] : memref<1x1xf32, #tpu.memory_space<vmem>>, vector<1x1xf32>
    %142 = vector.broadcast %141 : vector<1x1xf32> to vector<1x256xf32>
    %143 = arith.addf %140, %142 : vector<1x256xf32>
    %cst_39 = arith.constant 5.000000e-01 : f32
    %144 = vector.broadcast %cst_39 : f32 to vector<1x256xf32>
    %145 = arith.mulf %144, %143 : vector<1x256xf32>
    %146 = math.tanh %145 : vector<1x256xf32>
    %cst_40 = arith.constant 1.000000e+00 : f32
    %147 = vector.broadcast %cst_40 : f32 to vector<1x256xf32>
    %148 = arith.addf %146, %147 : vector<1x256xf32>
    %cst_41 = arith.constant 5.000000e-01 : f32
    %149 = vector.broadcast %cst_41 : f32 to vector<1x256xf32>
    %150 = arith.mulf %149, %148 : vector<1x256xf32>
    %151 = vector.broadcast %150 : vector<1x256xf32> to vector<4x256xf32>
    %152 = arith.mulf %81, %151 : vector<4x256xf32>
    %c1_42 = arith.constant 1 : index
    %c0_43 = arith.constant 0 : index
    %c0_44 = arith.constant 0 : index
    %153 = vector.load %arg9[%c1_42, %c0_43, %c0_44] : memref<2x4x256xf32, #tpu.memory_space<vmem>>, vector<1x4x256xf32>
    %154 = vector.shape_cast %153 : vector<1x4x256xf32> to vector<4x256xf32>
    %155 = vector.shape_cast %152 : vector<4x256xf32> to vector<1x4x256xf32>
    tpu.vector_store %arg9[%c1_42, %c0_43, %c0_44], %155 {strides = array<i32>} : memref<2x4x256xf32, #tpu.memory_space<vmem>>, vector<1x4x256xf32>,
    return
  }
  func.func @transform_0(%arg0: i32, %arg1: i32) -> (i32, i32, i32) {
    %c0_i32 = arith.constant 0 : i32
    %c0_i32_0 = arith.constant 0 : i32
    return %arg0, %c0_i32, %arg1 : i32, i32, i32
  }
  func.func @transform_1(%arg0: i32, %arg1: i32) -> (i32, i32, i32) {
    %c0_i32 = arith.constant 0 : i32
    %c0_i32_0 = arith.constant 0 : i32
    return %arg0, %c0_i32, %arg1 : i32, i32, i32
  }
  func.func @transform_2(%arg0: i32, %arg1: i32) -> (i32, i32) {
    %c0_i32 = arith.constant 0 : i32
    %c0_i32_0 = arith.constant 0 : i32
    %c0_i32_1 = arith.constant 0 : i32
    return %c0_i32, %c0_i32_0 : i32, i32
  }
  func.func @transform_3(%arg0: i32, %arg1: i32) -> (i32, i32) {
    %c0_i32 = arith.constant 0 : i32
    %c0_i32_0 = arith.constant 0 : i32
    %c0_i32_1 = arith.constant 0 : i32
    return %c0_i32, %c0_i32_0 : i32, i32
  }
  func.func @transform_4(%arg0: i32, %arg1: i32) -> (i32, i32) {
    %c0_i32 = arith.constant 0 : i32
    %c0_i32_0 = arith.constant 0 : i32
    %c0_i32_1 = arith.constant 0 : i32
    return %c0_i32, %c0_i32_0 : i32, i32
  }
  func.func @transform_5(%arg0: i32, %arg1: i32) -> (i32, i32) {
    %c0_i32 = arith.constant 0 : i32
    %c0_i32_0 = arith.constant 0 : i32
    %c0_i32_1 = arith.constant 0 : i32
    return %c0_i32, %c0_i32_0 : i32, i32
  }
  func.func @transform_6(%arg0: i32, %arg1: i32) -> (i32, i32) {
    %c0_i32 = arith.constant 0 : i32
    %c0_i32_0 = arith.constant 0 : i32
    %c0_i32_1 = arith.constant 0 : i32
    return %c0_i32, %c0_i32_0 : i32, i32
  }
  func.func @transform_7(%arg0: i32, %arg1: i32) -> (i32, i32, i32) {
    %c0_i32 = arith.constant 0 : i32
    %c0_i32_0 = arith.constant 0 : i32
    return %arg0, %c0_i32, %arg1 : i32, i32, i32
  }
}

</mosaic_0001>

<bundles_post_ra>
// kernel: tpu_custom_call.1
= control target key start
LH: loop header
LB: loop body
LE: loop exit
PB: predicated region body
PF: predicated region fallthrough
CT: control target
= control target key end

     0   :  { %s840_s0 = inlined_call_operand.vmem [shape: f32[2,4,256], index: 0, kind: input, shape index: {}]   ;;  %s841_s1 = inlined_call_operand.vmem [shape: f32[2,4,256], index: 1, kind: input, shape index: {}]   ;;  %s842_s2 = inlined_call_operand.vmem [shape: f32[8,4], index: 2, kind: input, shape index: {}]   ;;  %s843_s3 = inlined_call_operand.vmem [shape: f32[8,4], index: 3, kind: input, shape index: {}]   ;;  %s844_s4 = inlined_call_operand.vmem [shape: f32[8,1], index: 4, kind: input, shape index: {}]   ;;  %s845_s5 = inlined_call_operand.vmem [shape: f32[8,1], index: 5, kind: input, shape index: {}]   ;;  %s846_s6 = inlined_call_operand.<no memory space> [shape: f32[1,1], index: 6, kind: input, shape index: {}]   ;;  %s847_s7 = inlined_call_operand.hbm [shape: f32[2,4,256], index: 7, kind: output, shape index: {}]  }
   0x1   :  { %v12_v0 = vstv %s846_s6 }
   0x2   :  { %13 = vst [vmem:[#allocation2] sm:$0x1] %v12_v0 }
   0x3   :  { %v136_v1 = vld [vmem:[%s843_s3] sm:$0xff]  ;;  %v640_v3 = vmov 0  }
   0x4   :  { %v31_v2 = vld [vmem:[%s842_s2] sm:$0xff]  ;;  %599 = vset.pattern.permute.xlu1 %v640_v3  ;;  %597 = vset.pattern.permute.xlu0 %v640_v3 }
   0x5   :  { %139 = vperm.xlu1 %599, %v136_v1   ;;  %34 = vperm.xlu0 %597, %v31_v2  }
   0x6   :  { %14 = vsyncpa [#allocation4], 0  ;;  %v641_v4 = vmov 1   ;;  %v642_v5 = vmov 2   ;;  %v643_v6 = vmov 3   ;;  %v243_v7 = vld [vmem:[%s844_s4] sm:$0xff]  ;;  %v38_v11 = vlaneseq }
   0x7   :  { %v253_v9 = vld [vmem:[%s845_s5] sm:$0xff]  ;;  %v731_v27 = vld [vmem:[%s840_s0 + $0x8] sm:$0xff] }
   0x8   :  { %v39_v12 = vshrl.u32 %v38_v11, 7  ;;  %v711_v17 = vld [vmem:[%s841_s1] sm:$0xff]  ;;  %v738_v30 = vld [vmem:[%s841_s1 + $0x8] sm:$0xff] }
   0x9   :  { %600 = vset.pattern.permute.xlu1 %v641_v4  ;;  %598 = vset.pattern.permute.xlu0 %v641_v4  ;;  %v273_v8 = vld [vmem:[#allocation2] sm:$0x1] }
   0xa   :  { %164 = vperm.xlu1 %600, %v136_v1   ;;  %59 = vperm.xlu0 %598, %v31_v2   ;;  %v545_v10 = vld [vmem:[#allocation2] sm:$0x1]  ;;  %v706_v15 = vsub.s32 0, %v39_v12  ;;  %v44_v16 = vsub.s32 4, %v39_v12  ;;  %v64_v19 = vsub.s32 1, %v39_v12  ;;  %v68_v20 = vsub.s32 5, %v39_v12 }
   0xb   :  { %v716_v18 = vld [vmem:[%s840_s0] sm:$0xff]  ;;  %v90_v47 = vsub.s32 2, %v39_v12  ;;  %v94_v48 = vsub.s32 6, %v39_v12  ;;  %v767_v52 = vsub.s32 3, %v39_v12  ;;  %v769_v53 = vsub.s32 7, %v39_v12  ;;  %s644_s0 = smov [#allocation3]  }
   0xc   :  { %v146_v23 = vrot.slane %v711_v17, %v706_v15  ;;  %v150_v24 = vrot.slane %v711_v17, %v44_v16  ;;  %v41_v25 = vrot.slane %v716_v18, %v706_v15  ;;  %v45_v26 = vrot.slane %v716_v18, %v44_v16  ;;  %s577_s1 = sshll.u32 %s644_s0, 4  ;;  %s578_s1 = int_to_ptr.vmem [resolvable:$true] %s577_s1 }
   0xd   :  { %v170_v28 = vrot.slane %v711_v17, %v64_v19  ;;  %v174_v29 = vrot.slane %v711_v17, %v68_v20  ;;  %v65_v33 = vrot.slane %v716_v18, %v64_v19  ;;  %v313_v34 = vrot.slane %v731_v27, %v706_v15  ;;  %s616_s14 = scalar_lea.vmem %s578_s1, 256  ;;  %p621_p1 = scmp.lt.s32.totalorder %s578_s1, %s578_s1 }
   0xe   :  { %601 = vset.pattern.permute.xlu1 %v640_v3  ;;  %331 = vperm.xlu0 %598, %v31_v2   ;;  %v741_v31 = vrot.slane %v146_v23, %v706_v15  ;;  %v744_v32 = vrot.slane %v150_v24, %v706_v15  ;;  %v754_v37 = vrot.slane %v41_v25, %v706_v15  ;;  %p617_p0 = scmp.ne.s32.totalorder %s578_s1, %s616_s14  ;;  %p622_p2 = scmp.lt.s32.totalorder %s616_s14, %s616_s14 }
   0xf   :  { %306 = vperm.xlu1 %601, %v31_v2   ;;  %v757_v38 = vrot.slane %v45_v26, %v706_v15  ;;  %v69_v39 = vrot.slane %v716_v18, %v68_v20  ;;  %v317_v40 = vrot.slane %v731_v27, %v44_v16  ;;  %v337_v41 = vrot.slane %v731_v27, %v64_v19 }
  0x10   :  { %v341_v42 = vrot.slane %v731_v27, %v68_v20  ;;  %v418_v43 = vrot.slane %v738_v30, %v706_v15  ;;  %v422_v44 = vrot.slane %v738_v30, %v44_v16  ;;  %v180_v45 = vrot.slane %v170_v28, %v64_v19  ;;  %p623_p3 = por %p622_p2, %p621_p1 }
  0x11   :  { %v184_v46 = vrot.slane %v174_v29, %v64_v19  ;;  %v75_v49 = vrot.slane %v65_v33, %v64_v19  ;;  %v323_v50 = vrot.slane %v313_v34, %v706_v15  ;;  %v79_v54 = vrot.slane %v69_v39, %v64_v19 }
  0x12   :  { %436 = vperm.xlu0 %598, %v136_v1   ;;  %v327_v55 = vrot.slane %v317_v40, %v706_v15  ;;  %v442_v56 = vrot.slane %v738_v30, %v64_v19  ;;  %v446_v57 = vrot.slane %v738_v30, %v68_v20  ;;  %v347_v58 = vrot.slane %v337_v41, %v64_v19  ;;  %p624_p4 = pnand %p623_p3, %p617_p0 }
  0x13   :  { %411 = vperm.xlu1 %601, %v136_v1   ;;  %v351_v59 = vrot.slane %v341_v42, %v64_v19  ;;  %v428_v60 = vrot.slane %v418_v43, %v706_v15  ;;  %v432_v61 = vrot.slane %v422_v44, %v706_v15  ;;  %v196_v63 = vrot.slane %v711_v17, %v90_v47 }
  0x14   :  { %v200_v0 = vrot.slane %v711_v17, %v94_v48  ;;  %v367_v4 = vrot.slane %v731_v27, %v94_v48  ;;  %v498_v11 = vrot.slane %v738_v30, %v769_v53  ;;  %v452_v12 = vrot.slane %v442_v56, %v64_v19 }
  0x15   :  { %v456_v16 = vrot.slane %v446_v57, %v64_v19  ;;  %v222_v20 = vrot.slane %v711_v17, %v767_v52  ;;  %v226_v23 = vrot.slane %v711_v17, %v769_v53  ;;  %v389_v56 = vrot.slane %v731_v27, %v767_v52 }
  0x16   :  { %603 = vset.pattern.permute.xlu0 %v642_v5  ;;  %v210_v24 = vrot.slane %v200_v0, %v90_v47  ;;  %v377_v33 = vrot.slane %v367_v4, %v90_v47  ;;  %v508_v43 = vrot.slane %v498_v11, %v767_v52  ;;  %v393_v57 = vrot.slane %v731_v27, %v769_v53 }
  0x17   :  { %602 = vset.pattern.permute.xlu1 %v642_v5  ;;  %190 = vperm.xlu0 %603, %v136_v1   ;;  %v117_v5 = vrot.slane %v716_v18, %v767_v52  ;;  %v232_v44 = vrot.slane %v222_v20, %v767_v52 }
  0x18   :  { %85 = vperm.xlu1 %602, %v31_v2  }
  0x19   :  { %v127_v34 = vrot.slane %v117_v5, %v767_v52 }
  0x1b   :  { %604 = vset.pattern.permute.xlu0 %v643_v6 }
  0x1c   :  { %357 = vperm.xlu1 %602, %v31_v2   ;;  %111 = vperm.xlu0 %604, %v31_v2  }
  0x20   :  { %462 = vperm.xlu1 %602, %v136_v1   ;;  %488 = vperm.xlu0 %604, %v136_v1  }
  0x24   :  { %605 = vset.pattern.permute.xlu1 %v643_v6  ;;  %607 = vset.pattern.permute.xlu0 %v640_v3  ;;  %v121_v6 = vrot.slane %v716_v18, %v769_v53 }
  0x25   :  { %216 = vperm.xlu1 %605, %v136_v1   ;;  %518 = vperm.xlu0 %607, %v243_v7   ;;  %v91_v1 = vrot.slane %v716_v18, %v90_v47 }
  0x26   :  { %v131_v39 = vrot.slane %v121_v6, %v767_v52 }
  0x27   :  { %v101_v25 = vrot.slane %v91_v1, %v90_v47 }
  0x29   :  { %383 = vperm.xlu1 %605, %v31_v2   ;;  %276 = vperm.xlu0 %607, %v273_v8   ;;  %v95_v2 = vrot.slane %v716_v18, %v94_v48  ;;  %v468_v8 = vrot.slane %v738_v30, %v90_v47  ;;  %v206_v18 = vrot.slane %v196_v63, %v90_v47 }
  0x2b   :  { %v105_v26 = vrot.slane %v95_v2, %v90_v47  ;;  %v478_v41 = vrot.slane %v468_v8, %v90_v47 }
  0x2d   :  { %606 = vset.pattern.permute.xlu1 %v640_v3  ;;  %v363_v3 = vrot.slane %v731_v27, %v90_v47 }
  0x2e   :  { %246 = vperm.xlu1 %606, %v243_v7  }
  0x2f   :  { %v373_v29 = vrot.slane %v363_v3, %v90_v47 }
  0x32   :  { %256 = vperm.xlu1 %606, %v253_v9  }
  0x36   :  { %528 = vperm.xlu1 %606, %v253_v9   ;;  %v472_v9 = vrot.slane %v738_v30, %v94_v48  ;;  %v236_v48 = vrot.slane %v226_v23, %v767_v52 }
  0x38   :  { %v482_v19 = vrot.slane %v472_v9, %v90_v47 }
  0x3a   :  { %548 = vperm.xlu1 %606, %v545_v10   ;;  %v494_v10 = vrot.slane %v738_v30, %v767_v52 }
  0x3c   :  { %v504_v42 = vrot.slane %v494_v10, %v767_v52 }
  0x84   :  { %v702_v13 = vpop.permute.xlu1 %139  ;;  %v704_v14 = vpop.permute.xlu0 %34 }
  0x85   :  { %v161_v63 = vmul.f32 %v741_v31, %v702_v13  ;;  %v162_v47 = vmul.f32 %v744_v32, %v702_v13  ;;  %v56_v2 = vmul.f32 %v754_v37, %v704_v14  ;;  %v57_v3 = vmul.f32 %v757_v38, %v704_v14 }
  0x86   :  { %v399_v38 = vrot.slane %v389_v56, %v767_v52 }
  0x89   :  { %v718_v21 = vpop.permute.xlu1 %164  ;;  %v720_v22 = vpop.permute.xlu0 %59 }
  0x8a   :  { %v185_v0 = vmul.f32 %v180_v45, %v718_v21  ;;  %v186_v1 = vmul.f32 %v184_v46, %v718_v21  ;;  %v80_v4 = vmul.f32 %v75_v49, %v720_v22  ;;  %v81_v27 = vmul.f32 %v79_v54, %v720_v22 }
  0x8b   :  { %v403_v22 = vrot.slane %v393_v57, %v767_v52 }
  0x8c   :  { %v187_v8 = vadd.f32 %v185_v0, %v161_v63  ;;  %v188_v14 = vadd.f32 %v186_v1, %v162_v47  ;;  %v82_v49 = vadd.f32 %v80_v4, %v56_v2 }
  0x8d   :  { %v751_v36 = vpop.permute.xlu0 %331 }
  0x8e   :  { %v749_v35 = vpop.permute.xlu1 %306  ;;  %v352_v13 = vmul.f32 %v347_v58, %v751_v36  ;;  %v353_v32 = vmul.f32 %v351_v59, %v751_v36 }
  0x8f   :  { %v328_v53 = vmul.f32 %v323_v50, %v749_v35  ;;  %v329_v31 = vmul.f32 %v327_v55, %v749_v35  ;;  %v83_v50 = vadd.f32 %v81_v27, %v57_v3 }
  0x91   :  { %v437_v62 = vpop.permute.xlu0 %436  ;;  %v354_v55 = vadd.f32 %v352_v13, %v328_v53  ;;  %v355_v58 = vadd.f32 %v353_v32, %v329_v31 }
  0x92   :  { %v412_v51 = vpop.permute.xlu1 %411  ;;  %v457_v5 = vmul.f32 %v452_v12, %v437_v62  ;;  %v458_v37 = vmul.f32 %v456_v16, %v437_v62 }
  0x93   :  { %v433_v21 = vmul.f32 %v428_v60, %v412_v51  ;;  %v434_v46 = vmul.f32 %v432_v61, %v412_v51 }
  0x95   :  { %v459_v59 = vadd.f32 %v457_v5, %v433_v21  ;;  %v460_v60 = vadd.f32 %v458_v37, %v434_v46 }
  0x96   :  { %v191_v28 = vpop.permute.xlu0 %190 }
  0x97   :  { %v86_v7 = vpop.permute.xlu1 %85  ;;  %v211_v54 = vmul.f32 %v206_v18, %v191_v28  ;;  %v212_v35 = vmul.f32 %v210_v24, %v191_v28 }
  0x98   :  { %v106_v51 = vmul.f32 %v101_v25, %v86_v7  ;;  %v107_v61 = vmul.f32 %v105_v26, %v86_v7 }
  0x99   :  { %v213_v23 = vadd.f32 %v211_v54, %v187_v8  ;;  %v214_v52 = vadd.f32 %v212_v35, %v188_v14 }
  0x9b   :  { %v358_v40 = vpop.permute.xlu1 %357  ;;  %v112_v6 = vpop.permute.xlu0 %111 }
  0x9c   :  { %v378_v11 = vmul.f32 %v373_v29, %v358_v40  ;;  %v379_v12 = vmul.f32 %v377_v33, %v358_v40  ;;  %v132_v56 = vmul.f32 %v127_v34, %v112_v6  ;;  %v133_v57 = vmul.f32 %v131_v39, %v112_v6 }
  0x9e   :  { %v380_v7 = vadd.f32 %v378_v11, %v354_v55  ;;  %v381_v26 = vadd.f32 %v379_v12, %v355_v58 }
  0x9f   :  { %v463_v45 = vpop.permute.xlu1 %462  ;;  %v489_v62 = vpop.permute.xlu0 %488 }
  0xa0   :  { %v483_v9 = vmul.f32 %v478_v41, %v463_v45  ;;  %v484_v36 = vmul.f32 %v482_v19, %v463_v45  ;;  %v509_v28 = vmul.f32 %v504_v42, %v489_v62  ;;  %v510_v63 = vmul.f32 %v508_v43, %v489_v62 }
  0xa1   :  { %v108_v41 = vadd.f32 %v106_v51, %v82_v49  ;;  %v109_v19 = vadd.f32 %v107_v61, %v83_v50 }
  0xa2   :  { %v485_v18 = vadd.f32 %v483_v9, %v459_v59  ;;  %v486_v24 = vadd.f32 %v484_v36, %v460_v60 }
  0xa3   :  { %v134_v33 = vadd.f32 %v132_v56, %v108_v41  ;;  %v135_v40 = vadd.f32 %v133_v57, %v109_v19 }
  0xa4   :  { %v217_v10 = vpop.permute.xlu1 %216  ;;  %v519_v27 = vpop.permute.xlu0 %518 }
  0xa5   :  { %v237_v16 = vmul.f32 %v232_v44, %v217_v10  ;;  %v238_v20 = vmul.f32 %v236_v48, %v217_v10  ;;  %v511_v44 = vadd.f32 %v509_v28, %v485_v18  ;;  %v512_v48 = vadd.f32 %v510_v63, %v486_v24 }
  0xa7   :  { %v239_v47 = vadd.f32 %v237_v16, %v213_v23  ;;  %v240_v0 = vadd.f32 %v238_v20, %v214_v52 }
  0xa8   :  { %v384_v25 = vpop.permute.xlu1 %383  ;;  %v277_v51 = vpop.permute.xlu0 %276 }
  0xa9   :  { %v404_v1 = vmul.f32 %v399_v38, %v384_v25  ;;  %v405_v29 = vmul.f32 %v403_v22, %v384_v25  ;;  %v241_v39 = vadd.f32 %v239_v47, %v134_v33  ;;  %v242_v3 = vadd.f32 %v240_v0, %v135_v40 }
  0xaa   :  { %v282_v20 = vrot.slane %v277_v51, %v706_v15 }
  0xab   :  { %v406_v2 = vadd.f32 %v404_v1, %v380_v7  ;;  %v407_v34 = vadd.f32 %v405_v29, %v381_v26 }
  0xad   :  { %v247_v4 = vpop.permute.xlu1 %246  ;;  %v513_v42 = vadd.f32 %v511_v44, %v406_v2  ;;  %v514_v43 = vadd.f32 %v512_v48, %v407_v34 }
  0xae   :  { %v249_v53 = vadd.f32 %v247_v4, %v241_v39  ;;  %v250_v31 = vadd.f32 %v247_v4, %v242_v3 }
  0xaf   :  { %v521_v45 = vadd.f32 %v519_v27, %v513_v42  ;;  %v522_v21 = vadd.f32 %v519_v27, %v514_v43 }
  0xb0   :  { %v251_v13 = vmax.f32 %v249_v53, 0.0  ;;  %v252_v32 = vmax.f32 %v250_v31, 0.0 }
  0xb1   :  { %v257_v46 = vpop.permute.xlu1 %256  ;;  %v523_v6 = vmax.f32 %v521_v45, 0.0  ;;  %v524_v8 = vmax.f32 %v522_v21, 0.0 }
  0xb2   :  { %v259_v5 = vmul.f32 %v257_v46, %v251_v13  ;;  %v260_v37 = vmul.f32 %v257_v46, %v252_v32 }
  0xb4   :  { %v261_v14 = vrot.slane %v259_v5, 4  ;;  %v267_v38 = vrot.slane %v260_v37, 4 }
  0xb5   :  { %v529_v22 = vpop.permute.xlu1 %528 }
  0xb6   :  { %v262_v49 = vadd.f32 %v261_v14, %v259_v5  ;;  %v268_v50 = vadd.f32 %v267_v38, %v260_v37  ;;  %v531_v54 = vmul.f32 %v529_v22, %v523_v6  ;;  %v532_v35 = vmul.f32 %v529_v22, %v524_v8 }
  0xb8   :  { %v263_v55 = vrot.slane %v262_v49, 2  ;;  %v269_v58 = vrot.slane %v268_v50, 2  ;;  %v533_v9 = vrot.slane %v531_v54, 4  ;;  %v539_v36 = vrot.slane %v532_v35, 4 }
  0xb9   :  { %v549_v18 = vpop.permute.xlu1 %548 }
  0xba   :  { %v264_v59 = vadd.f32 %v263_v55, %v262_v49  ;;  %v270_v60 = vadd.f32 %v269_v58, %v268_v50  ;;  %v534_v61 = vadd.f32 %v533_v9, %v531_v54  ;;  %v540_v62 = vadd.f32 %v539_v36, %v532_v35 }
  0xbb   :  { %v554_v19 = vrot.slane %v549_v18, %v706_v15 }
  0xbc   :  { %v265_v10 = vrot.slane %v264_v59, 1  ;;  %v271_v11 = vrot.slane %v270_v60, 1  ;;  %v535_v12 = vrot.slane %v534_v61, 2  ;;  %v541_v16 = vrot.slane %v540_v62, 2 }
  0xbe   :  { %v266_v23 = vadd.f32 %v265_v10, %v264_v59  ;;  %v272_v52 = vadd.f32 %v271_v11, %v270_v60  ;;  %v536_v56 = vadd.f32 %v535_v12, %v534_v61  ;;  %v542_v57 = vadd.f32 %v541_v16, %v540_v62 }
  0xc0   :  { %v283_v24 = vadd.f32 %v282_v20, %v266_v23  ;;  %v284_v28 = vadd.f32 %v282_v20, %v272_v52  ;;  %v537_v63 = vrot.slane %v536_v56, 1  ;;  %v543_v41 = vrot.slane %v542_v57, 1 }
  0xc2   :  { %v285_v47 = vmul.f32 0.5, %v283_v24  ;;  %v286_v0 = vmul.f32 0.5, %v284_v28  ;;  %v538_v25 = vadd.f32 %v537_v63, %v536_v56  ;;  %v544_v7 = vadd.f32 %v543_v41, %v542_v57 }
  0xc4   :  { %608 = vtanh.f32 %v285_v47  ;;  %v555_v26 = vadd.f32 %v554_v19, %v538_v25  ;;  %v556_v1 = vadd.f32 %v554_v19, %v544_v7 }
  0xc5   :  { %610 = vtanh.f32 %v286_v0 }
  0xc6   :  { %v557_v29 = vmul.f32 0.5, %v555_v26  ;;  %v558_v33 = vmul.f32 0.5, %v556_v1 }
  0xc8   :  { %612 = vtanh.f32 %v557_v29 }
  0xc9   :  { %614 = vtanh.f32 %v558_v33 }
  0xce   :  { %v609_v40 = vpop.eup %608 }
  0xcf   :  { %v611_v44 = vpop.eup %610  ;;  %v289_v48 = vadd.f32 1.0, %v609_v40 }
  0xd0   :  { %v290_v2 = vadd.f32 1.0, %v611_v44 }
  0xd1   :  { %v291_v34 = vmul.f32 0.5, %v289_v48 }
  0xd2   :  { %v613_v39 = vpop.eup %612  ;;  %v292_v3 = vmul.f32 0.5, %v290_v2 }
  0xd3   :  { %v615_v15 = vpop.eup %614  ;;  %v561_v4 = vadd.f32 1.0, %v613_v39 }
  0xd4   :  { %v295_v42 = vcombine.low %v291_v34, %v292_v3  ;;  %v562_v43 = vadd.f32 1.0, %v615_v15 }
  0xd5   :  { %v563_v27 = vmul.f32 0.5, %v561_v4 }
  0xd6   :  { %v564_v53 = vmul.f32 0.5, %v562_v43  ;;  %v297_v31 = vmul.f32 %v295_v42, %v711_v17 }
  0xd8   :  { %v567_v13 = vcombine.low %v563_v27, %v564_v53  ;;  %298 = vst [vmem:[#allocation3] sm:$0xff] %v297_v31 }
  0xda   :  { %v569_v32 = vmul.f32 %v738_v30, %v567_v13 }
  0xdc   :  { %571 = vst [vmem:[#allocation3 + $0x8] sm:$0xff] %v569_v32 }
  0xdd   :  { %627 = shalt.err (!%p624_p4)
}
  0xde   :  { %s628_s17 = scalar_lea.hbm %s847_s7, 256 }
  0xdf   :  { %p629_p5 = scmp.ne.s32.totalorder %s847_s7, %s628_s17  ;;  %p632_p6 = scmp.lt.u32.totalorder %s628_s17, %s847_s7 }
  0xe1   :  { %p634_p7 = pnand %p632_p6, %p629_p5 }
  0xe3   :  { %637 = shalt.err (!%p634_p7)
}
  0xe4   :  { %s645_s22 = smov 128   ;;  %s646_s23 = smov 8  }
  0xe5   :  { %583 = dma.vmem_to_hbm [thread:$0]  %s578_s1, 256, %s847_s7, [#allocation4], %s645_s22, %s645_s22, %s646_s23  }
  0xe6   :  { %638 = dma.done.wait [#allocation4], 256  }
  0xe7   :  { %639 = vsyncadd [#allocation4], 4294967040 }
  0xe8   :  { %587 = vsyncpa [#allocation4], 1 }

</bundles_post_ra>
